<compile_context>
chip_gen: v7x
topology: tpu7x:2x2x1
jax: 0.10.0
libtpu: 0.0.40
codegen_flags: <defaults>
</compile_context>

<pallas_src>
import functools
import math

import jax
import jax.numpy as jnp
from jax.experimental import pallas as pl
from jax.experimental.pallas import tpu as pltpu

_LANES = 128
_MIB = 1024 * 1024


def _round_up(v: int, m: int) -> int:
    return (v + m - 1) // m * m


def _physical_vmem_bytes() -> int:
    """Per-TensorCore VMEM; conservative (v7x-sized) fallback if the query fails."""
    try:
        vmem = int(pltpu.get_tpu_info().vmem_capacity_bytes)
        if vmem > 0:
            return vmem
    except Exception:
        pass
    return 64 * _MIB  # v7x per-TC size; safe lower bound for v5e/v6e too


def _pick_tile_n(n_tokens: int, hidden: int, itemsize: int, vmem_bytes: int) -> int:
    """Byte-budgeted row tile (multiple of 128).

    Targets multi-MiB x DMAs (amortizes the ~0.35us per-grid-step overhead),
    keeps two pipeline buffers well inside physical VMEM, and keeps the grid
    >= 4 steps when the problem allows so both v7x TensorCores get work.
    """
    # VMEM footprint per row uses the lane-padded hidden dim (H < 128 pads up).
    bytes_per_row = _round_up(hidden, _LANES) * itemsize
    # Per-buffer x budget: >= 4 MiB, <= 16 MiB, and <= ~1/4 of physical VMEM.
    x_buf_budget = max(4 * _MIB, min(16 * _MIB, vmem_bytes // 4))
    rows = max(_LANES, (x_buf_budget // bytes_per_row) // _LANES * _LANES)
    # Never tile coarser than the (128-rounded) problem itself.
    n_round = _round_up(max(n_tokens, 1), _LANES)
    rows = min(rows, n_round)
    # Keep >= 4 grid steps when possible (megacore split + per-core pipelining).
    target_g = min(4, n_round // _LANES)
    if target_g >= 2:
        rows = min(rows, max(_LANES, _round_up(pl.cdiv(n_tokens, target_g), _LANES)))
    return int(rows)


def _pick_vmem_limit(tile_n: int, hidden: int, itemsize: int, vmem_bytes: int) -> int:
    """Scoped VMEM limit: double-buffered x tiles + small residents, with headroom."""
    bytes_per_row = _round_up(hidden, _LANES) * itemsize
    limit = 2 * tile_n * bytes_per_row + 4 * _MIB   # 2 x-bufs + weight/mask/out/slack
    limit = max(limit, 16 * _MIB)                   # at least the small-case default
    limit = min(limit, vmem_bytes - 8 * _MIB)       # never approach physical VMEM
    return int(limit)


def _classifier_kernel(x_ref, w_ref, b_ref, mask_ref, o_ref):
    # x_ref:    [TILE_N, H]   activations (bf16 or f32), streamed tiles
    # w_ref:    [1, H]        linear weight row (x dtype), resident
    # b_ref:    [1]           bias, f32 scalar in SMEM
    # mask_ref: [1, TILE_N]   mask_cls tile (f32), lane-dense
    # o_ref:    [1, TILE_N]   sigmoid(x @ w^T + b) * mask, f32, lane-dense
    #
    # logits[0, n] = sum_h w[0, h] * x[n, h]  -> lane-dense (1, TILE_N) row on the MXU.
    logits = jax.lax.dot_general(
        w_ref[...],
        x_ref[...],
        dimension_numbers=(((1,), (1,)), ((), ())),   # contract H on both sides
        preferred_element_type=jnp.float32,           # f32 MXU accumulation
    )                                                  # [1, TILE_N]
    probs = jax.nn.sigmoid(logits + b_ref[0])          # EUP/VPU, f32
    o_ref[...] = (probs * mask_ref[...]).astype(o_ref.dtype)


@functools.partial(jax.jit, static_argnames=("tile_n", "vmem_limit_bytes"))
def _classifier_impl(x, mask_cls, weight, bias, *, tile_n, vmem_limit_bytes):
    B, S, H = x.shape
    N = B * S
    g = pl.cdiv(N, tile_n)                                   # ragged tail handled by clamping

    x_flat = x.reshape(N, H)                                 # view -- NO padded copy of x
    mask_row = mask_cls.reshape(1, N).astype(jnp.float32)    # tiny; keep f32 (exact)
    w_row = weight.reshape(1, H).astype(x.dtype)             # matches MXU operand dtype
    b_smem = bias.reshape(1).astype(jnp.float32)             # SMEM scalar

    itemsize = x.dtype.itemsize
    cost = pl.CostEstimate(
        flops=2 * N * H,                                     # the H->1 projection
        transcendentals=N,                                   # sigmoid per token
        bytes_accessed=N * H * itemsize                      # x read (dominant)
        + H * itemsize                                       # weight
        + 2 * N * 4                                          # mask read + out write (f32)
        + 4,                                                 # bias
    )

    out = pl.pallas_call(
        _classifier_kernel,
        grid=(g,),
        in_specs=[
            pl.BlockSpec((tile_n, H), lambda i: (i, 0)),          # x: streamed, clamped tail
            pl.BlockSpec((1, H), lambda i: (0, 0)),               # weight: resident
            pl.BlockSpec(memory_space=pltpu.MemorySpace.SMEM),    # bias: SMEM scalar
            pl.BlockSpec((1, tile_n), lambda i: (0, i)),          # mask: lane-dense
        ],
        out_specs=pl.BlockSpec((1, tile_n), lambda i: (0, i)),    # lane-dense output row
        out_shape=jax.ShapeDtypeStruct((1, N), jnp.float32),
        compiler_params=pltpu.CompilerParams(
            dimension_semantics=("parallel",),        # megacore sharding on v7x
            vmem_limit_bytes=vmem_limit_bytes,        # sized per generation / tile
        ),
        cost_estimate=cost,
    )(x_flat, w_row, b_smem, mask_row)

    return out.reshape(B, S)


def classifier_forward(x, mask_cls, weight, bias, *, tile_n=None):
    """Pallas forward for the PyTorch Classifier module.

    x: [B, S, H] (f32 or bf16), mask_cls: [B, S] (any numeric dtype),
    weight: [1, H] (PyTorch nn.Linear layout), bias: [1].
    Returns sigmoid(x @ weight.T + bias).squeeze(-1) * mask_cls.float() as [B, S] f32.
    """
    B, S, H = x.shape
    N = B * S
    itemsize = jnp.dtype(x.dtype).itemsize
    vmem_bytes = _physical_vmem_bytes()
    if tile_n is None:
        tile_n = _pick_tile_n(N, H, itemsize, vmem_bytes)
    vmem_limit = _pick_vmem_limit(int(tile_n), H, itemsize, vmem_bytes)
    return _classifier_impl(x, mask_cls, weight, bias,
                            tile_n=int(tile_n), vmem_limit_bytes=int(vmem_limit))


if __name__ == "__main__":
    # Small shapes consistent with the module's forward: batch=2, seq=8, hidden=32.
    B, S, H = 2, 8, 32
    key = jax.random.PRNGKey(0)
    kx, km, kw, kb = jax.random.split(key, 4)

    x = jax.random.normal(kx, (B, S, H), dtype=jnp.float32)
    mask_cls = (jax.random.uniform(km, (B, S)) > 0.3).astype(jnp.int32)

    # Parameters with nn.Linear(hidden_size, 1) shapes: weight [1, H], bias [1].
    bound = 1.0 / math.sqrt(H)
    weight = jax.random.uniform(kw, (1, H), minval=-bound, maxval=bound, dtype=jnp.float32)
    bias = jax.random.uniform(kb, (1,), minval=-bound, maxval=bound, dtype=jnp.float32)

    out = classifier_forward(x, mask_cls, weight, bias)
    out = jax.block_until_ready(out)

    ref = jax.nn.sigmoid(jnp.einsum("bsh,h->bs", x, weight[0],
                                    precision=jax.lax.Precision.HIGHEST) + bias[0])
    ref = ref * mask_cls.astype(jnp.float32)
    assert out.shape == (B, S)
    assert jnp.allclose(out, ref, atol=2e-5, rtol=2e-5), (
        f"max abs err = {jnp.max(jnp.abs(out - ref))}")

    # Second check: non-128-divisible token count exercises the ragged last block
    # (no padded x copy; clamped block DMAs) and a multi-step grid.
    B2, S2, H2 = 3, 100, 256
    k2x, k2m, k2w, k2b = jax.random.split(jax.random.PRNGKey(1), 4)
    x2 = jax.random.normal(k2x, (B2, S2, H2), dtype=jnp.float32)
    m2 = (jax.random.uniform(k2m, (B2, S2)) > 0.5).astype(jnp.float32)
    b2 = 1.0 / math.sqrt(H2)
    w2 = jax.random.uniform(k2w, (1, H2), minval=-b2, maxval=b2, dtype=jnp.float32)
    bb2 = jax.random.uniform(k2b, (1,), minval=-b2, maxval=b2, dtype=jnp.float32)

    out2 = jax.block_until_ready(classifier_forward(x2, m2, w2, bb2))
    ref2 = jax.nn.sigmoid(jnp.einsum("bsh,h->bs", x2, w2[0],
                                     precision=jax.lax.Precision.HIGHEST) + bb2[0]) * m2
    assert out2.shape == (B2, S2)
    assert jnp.allclose(out2, ref2, atol=1e-4, rtol=1e-4), (
        f"max abs err = {jnp.max(jnp.abs(out2 - ref2))}")

    print("KERNEL_OK")
</pallas_src>

<mosaic_0001>
module attributes {stable_mosaic.version = 11 : i64} {
  func.func @_classifier_kernel(%arg0: i32, %arg1: memref<128x32xf32, #tpu.memory_space<vmem>>, %arg2: memref<1x32xf32, #tpu.memory_space<vmem>>, %arg3: memref<1xf32, #tpu.memory_space<smem>>, %arg4: memref<1x128xf32, #tpu.memory_space<vmem>>, %arg5: memref<1x128xf32, #tpu.memory_space<vmem>>) attributes {dimension_semantics = [#tpu.dimension_semantics<parallel>], iteration_bounds = array<i64: 1>, scalar_prefetch = 0 : i64, scratch_operands = 0 : i64, tpu.core_type = #tpu.core_type<tc>, window_params = [{transform_indices = @transform_0, window_bounds = array<i64: 128, 32>}, {pipeline_mode = #tpu.pipeline_mode<synchronous>, transform_indices = @transform_1, window_bounds = array<i64: 1, 32>}, {transform_indices = @transform_2, window_bounds = array<i64: 1>}, {transform_indices = @transform_3, window_bounds = array<i64: 1, 128>}, {transform_indices = @transform_4, window_bounds = array<i64: 1, 128>}]} {
    %c0 = arith.constant 0 : index
    %c0_0 = arith.constant 0 : index
    %0 = vector.load %arg2[%c0, %c0_0] : memref<1x32xf32, #tpu.memory_space<vmem>>, vector<1x32xf32>
    %c0_1 = arith.constant 0 : index
    %c0_2 = arith.constant 0 : index
    %1 = vector.load %arg1[%c0_1, %c0_2] : memref<128x32xf32, #tpu.memory_space<vmem>>, vector<128x32xf32>
    %cst = arith.constant dense<0.000000e+00> : vector<1x128xf32>
    %2 = tpu.matmul %0, %1, %cst {dimension_numbers = #tpu.dot_dimension_numbers<[1], [1], [0], [0], [0, 0, 1, 0], [], []>} : vector<1x32xf32>, vector<128x32xf32>, vector<1x128xf32> -> vector<1x128xf32>
    %c0_3 = arith.constant 0 : index
    %3 = memref.load %arg3[%c0_3] : memref<1xf32, #tpu.memory_space<smem>>
    %4 = vector.broadcast %3 : f32 to vector<1x128xf32>
    %5 = arith.addf %2, %4 : vector<1x128xf32>
    %6 = arith.negf %5 : vector<1x128xf32>
    %7 = math.exp %6 : vector<1x128xf32>
    %cst_4 = arith.constant 1.000000e+00 : f32
    %8 = vector.broadcast %cst_4 : f32 to vector<1x128xf32>
    %9 = arith.addf %8, %7 : vector<1x128xf32>
    %10 = arith.divf %8, %9 : vector<1x128xf32>
    %c0_5 = arith.constant 0 : index
    %c0_6 = arith.constant 0 : index
    %11 = vector.load %arg4[%c0_5, %c0_6] : memref<1x128xf32, #tpu.memory_space<vmem>>, vector<1x128xf32>
    %12 = arith.mulf %10, %11 : vector<1x128xf32>
    %c0_7 = arith.constant 0 : index
    %c0_8 = arith.constant 0 : index
    %13 = vector.load %arg5[%c0_7, %c0_8] : memref<1x128xf32, #tpu.memory_space<vmem>>, vector<1x128xf32>
    tpu.vector_store %arg5[%c0_7, %c0_8], %12 {strides = array<i32>} : memref<1x128xf32, #tpu.memory_space<vmem>>, vector<1x128xf32>,
    return
  }
  func.func @transform_0(%arg0: i32) -> (i32, i32) {
    %c0_i32 = arith.constant 0 : i32
    %c0_i32_0 = arith.constant 0 : i32
    return %arg0, %c0_i32 : i32, i32
  }
  func.func @transform_1(%arg0: i32) -> (i32, i32) {
    %c0_i32 = arith.constant 0 : i32
    %c0_i32_0 = arith.constant 0 : i32
    %c0_i32_1 = arith.constant 0 : i32
    return %c0_i32, %c0_i32_0 : i32, i32
  }
  func.func @transform_2(%arg0: i32) -> i32 {
    %c0_i32 = arith.constant 0 : i32
    %c0_i32_0 = arith.constant 0 : i32
    return %c0_i32 : i32
  }
  func.func @transform_3(%arg0: i32) -> (i32, i32) {
    %c0_i32 = arith.constant 0 : i32
    %c0_i32_0 = arith.constant 0 : i32
    return %c0_i32, %arg0 : i32, i32
  }
  func.func @transform_4(%arg0: i32) -> (i32, i32) {
    %c0_i32 = arith.constant 0 : i32
    %c0_i32_0 = arith.constant 0 : i32
    return %c0_i32, %arg0 : i32, i32
  }
}

</mosaic_0001>

<bundles_post_ra>
// kernel: _classifier_impl.1
= control target key start
LH: loop header
LB: loop body
LE: loop exit
PB: predicated region body
PF: predicated region fallthrough
CT: control target
= control target key end

     0   :  { %vm37_vm0 = vcmask 261120   ;;  %v281_v0 = vmov 0.0|0.0   ;;  %vm282_vm2 = vmmov 0   ;;  %v283_v4 = vmov 0.0   ;;  %s392_s0 = inlined_call_operand.vmem [shape: f32[16,32], index: 0, kind: input, shape index: {}]   ;;  %s393_s1 = inlined_call_operand.vmem [shape: f32[1,32], index: 1, kind: input, shape index: {}]   ;;  %s394_s2 = inlined_call_operand.<no memory space> [shape: f32[1], index: 2, kind: input, shape index: {}]   ;;  %s395_s3 = inlined_call_operand.vmem [shape: f32[1,16], index: 3, kind: input, shape index: {}]   ;;  %s396_s4 = inlined_call_operand.vmem [shape: f32[1,16], index: 4, kind: output, shape index: {}]  }
   0x1   :  { %242 = vmatprep.subr.bf16.mxu0 %v281_v0  ;;  %v19_v1 = vld [vmem:[%s392_s0] sm:$0xff]  ;;  %v20_v2 = vld [vmem:[%s392_s0 + $0x8] sm:$0xff]  ;;  %vm317_vm1 = vmpackc.low %vm37_vm0, %vm37_vm0  ;;  %239 = vmatprep.mubr.msk.f32.mxu0 %vm282_vm2, %v283_v4  ;;  %v36_v28 = vstv %s394_s2 }
   0x2   :  { %v243_v5 = vpack.c.bf16 %v20_v2, %v19_v1  ;;  %v21_v6 = vld [vmem:[%s392_s0 + $0x10] sm:$0xff]  ;;  %v22_v7 = vld [vmem:[%s392_s0 + $0x18] sm:$0xff]  ;;  %v23_v9 = vld [vmem:[%s392_s0 + $0x20] sm:$0xff] }
   0x3   :  { %v247_v8 = vpack.c.bf16 %v22_v7, %v21_v6  ;;  %v24_v10 = vld [vmem:[%s392_s0 + $0x28] sm:$0xff]  ;;  %v25_v12 = vld [vmem:[%s392_s0 + $0x30] sm:$0xff]  ;;  %v26_v13 = vld [vmem:[%s392_s0 + $0x38] sm:$0xff] }
   0x4   :  { %245 = vmatpush3.bf16.xpose.msk.msra.mxu0 %vm317_vm1, %v243_v5  ;;  %v251_v11 = vpack.c.bf16 %v24_v10, %v23_v9  ;;  %v255_v14 = vpack.c.bf16 %v26_v13, %v25_v12  ;;  %v27_v15 = vld [vmem:[%s392_s0 + $0x40] sm:$0xff]  ;;  %v28_v16 = vld [vmem:[%s392_s0 + $0x48] sm:$0xff]  ;;  %v29_v18 = vld [vmem:[%s392_s0 + $0x50] sm:$0xff] }
   0x5   :  { %246 = vmatprep.subr.bf16.mxu0 %v281_v0  ;;  %v259_v17 = vpack.c.bf16 %v28_v16, %v27_v15  ;;  %v30_v19 = vld [vmem:[%s392_s0 + $0x58] sm:$0xff]  ;;  %v31_v21 = vld [vmem:[%s392_s0 + $0x60] sm:$0xff]  ;;  %v32_v22 = vld [vmem:[%s392_s0 + $0x68] sm:$0xff] }
   0x6   :  { %v263_v20 = vpack.c.bf16 %v30_v19, %v29_v18  ;;  %v267_v23 = vpack.c.bf16 %v32_v22, %v31_v21  ;;  %v33_v24 = vld [vmem:[%s392_s0 + $0x70] sm:$0xff]  ;;  %v34_v25 = vld [vmem:[%s392_s0 + $0x78] sm:$0xff]  ;;  %v18_v27 = vld [vmem:[%s393_s1] sm:$0x1] }
   0x7   :  { %v271_v26 = vpack.c.bf16 %v34_v25, %v33_v24  ;;  %v165_v35 = vld [vmem:[%s395_s3] sm:$0x1] }
   0xc   :  { %249 = vmatpush3.bf16.xpose.msk.msra.mxu0 %vm317_vm1, %v247_v8 }
   0xd   :  { %250 = vmatprep.subr.bf16.mxu0 %v281_v0 }
  0x14   :  { %253 = vmatpush3.bf16.xpose.msk.msra.mxu0 %vm317_vm1, %v251_v11 }
  0x15   :  { %254 = vmatprep.subr.bf16.mxu0 %v281_v0 }
  0x1c   :  { %257 = vmatpush3.bf16.xpose.msk.msra.mxu0 %vm317_vm1, %v255_v14 }
  0x1d   :  { %258 = vmatprep.subr.bf16.mxu0 %v281_v0 }
  0x24   :  { %261 = vmatpush3.bf16.xpose.msk.msra.mxu0 %vm317_vm1, %v259_v17 }
  0x25   :  { %262 = vmatprep.subr.bf16.mxu0 %v281_v0 }
  0x2c   :  { %265 = vmatpush3.bf16.xpose.msk.msra.mxu0 %vm317_vm1, %v263_v20 }
  0x2d   :  { %266 = vmatprep.subr.bf16.mxu0 %v281_v0 }
  0x34   :  { %269 = vmatpush3.bf16.xpose.msk.msra.mxu0 %vm317_vm1, %v267_v23 }
  0x35   :  { %270 = vmatprep.subr.bf16.mxu0 %v281_v0 }
  0x3c   :  { %273 = vmatpush3.bf16.xpose.msk.msra.mxu0 %vm317_vm1, %v271_v26 }
  0x43   :  { %240 = vmatmul.mubr.msk.f32.vlgmr.msra.gmra.mrb[0].mxu0 %vm37_vm0, %v18_v27 }
 0x116   :  { %v155_v29 = vpop.f32.mrb[0].mxu0 }
 0x117   :  { %v156_v30 = vadd.f32 %v155_v29, %v36_v28  ;;  %v241_v31 = vpop.f32.mrb[1].mxu0 }
 0x119   :  { %v189_v32 = vmul.f32 -1.442695, %v156_v30 }
 0x11b   :  { %277 = vpow2.f32 %v189_v32 }
 0x125   :  { %v278_v33 = vpop.eup %277 }
 0x126   :  { %v162_v34 = vadd.f32 1.0, %v278_v33 }
 0x128   :  { %279 = vrcp.f32 %v162_v34 }
 0x132   :  { %v280_v36 = vpop.eup %279 }
 0x133   :  { %v166_v37 = vmul.f32 %v280_v36, %v165_v35 }
 0x135   :  { %167 = vst [vmem:[%s396_s4] sm:$0x1] %v166_v37 }

</bundles_post_ra>
